<compile_context>
chip_gen: v7x
topology: tpu7x:2x2x1
jax: 0.10.0
libtpu: 0.0.40
codegen_flags: <defaults>
</compile_context>

<pallas_src>
import functools
import math

import jax
import jax.numpy as jnp
from jax import lax
from jax.experimental import pallas as pl
from jax.experimental.pallas import tpu as pltpu


def _round_up(x, m):
    return ((x + m - 1) // m) * m


def _cdiv(a, b):
    return (a + b - 1) // b


def _next_pow2(n):
    return 1 << max(0, int(n) - 1).bit_length()


def _growth_len(seq_len):
    # Coarse growth chunks: avoids a new pallas_call trace + Mosaic compile per distinct length.
    if seq_len <= 8192:
        return _next_pow2(seq_len)
    return _round_up(seq_len, 8192)


def _rope_cache_kernel(pos_off_ref, invf_ref, cos_ref, sin_ref, *, fold, half, dedup):
    """Writes one (R, fold*dim) block of the cos / sin caches.

    Eval layout (lane-dense, every lane unique when dedup=True):
      lane l of the eval row -> position offset pos_off_ref[l], frequency invf_ref[l];
      row r covers positions start + r*fold .. start + r*fold + fold-1.
    """
    R = cos_ref.shape[0]
    w_eval = invf_ref.shape[1]

    start = pl.program_id(0) * (R * fold)                        # first position of this block
    row = lax.broadcasted_iota(jnp.int32, (R, w_eval), 0)
    pos = (start + row * fold).astype(jnp.float32) + pos_off_ref[...]
    phase = pos * invf_ref[...]                                  # (R, w_eval)
    c = jnp.cos(phase)
    s = jnp.sin(phase)

    if not dedup:
        # Every output lane was evaluated directly (duplicates included); plain store.
        cos_ref[...] = c.astype(cos_ref.dtype)
        sin_ref[...] = s.astype(sin_ref.dtype)
        return

    if fold == 1:
        # dim >= 256 with half % 128 == 0: eval row is one position's unique half.
        c0 = c1 = c
        s0 = s1 = s
    else:
        # fold == 2 (dim % 128 == 0, half % 128 != 0, e.g. head_dim 128):
        # eval row = [pos p | pos p+1], each `half` lanes; rebuild the duplicated
        # layout with one XLU roll + selects (VALU/EUP stay on the unique work only).
        first = lax.broadcasted_iota(jnp.int32, (1, w_eval), 1) < half
        c_sw = pltpu.roll(c, shift=half, axis=1)                 # [p+1 | p]
        s_sw = pltpu.roll(s, shift=half, axis=1)
        c0 = jnp.where(first, c, c_sw)                           # [p   | p  ]
        c1 = jnp.where(first, c_sw, c)                           # [p+1 | p+1]
        s0 = jnp.where(first, s, s_sw)
        s1 = jnp.where(first, s_sw, s)

    # 128-aligned slice stores into the (R, 2*w_eval) output block.
    cos_ref[:, :w_eval] = c0.astype(cos_ref.dtype)
    cos_ref[:, w_eval:] = c1.astype(cos_ref.dtype)
    sin_ref[:, :w_eval] = s0.astype(sin_ref.dtype)
    sin_ref[:, w_eval:] = s1.astype(sin_ref.dtype)


def _build_rope_cache(seq_len, dim, inv_freq, out_dtype, *, max_block_bytes=512 * 1024):
    """Builds padded cos/sin caches of shape (>= seq_len, dim) with one pallas_call.

    The caches may be padded past seq_len; callers slice [:seq_len].
    """
    assert dim % 2 == 0, "rotary dim must be even"
    out_dtype = jnp.dtype(out_dtype)
    itemsize = out_dtype.itemsize
    half = dim // 2
    inv_freq = jnp.asarray(inv_freq, jnp.float32).reshape(half)

    # Lane layout.  `fold` = positions per output row; output width is always a
    # multiple of 128 so every store is an unmasked, lane-dense vst.
    if dim % 128 == 0:
        # Deduplicated path: only unique (position, k) phases are evaluated.
        dedup = True
        fold = 1 if half % 128 == 0 else 2
        w_eval = fold * half
    else:
        # TODO(synk): dims not a multiple of 128 still evaluate both duplicated halves;
        # a lane block-repeat network (rolls + selects) could extend dedup to them.
        dedup = False
        fold = 128 // math.gcd(dim, 128)
        w_eval = fold * dim
    w_out = fold * dim                                            # multiple of 128

    lane = jnp.arange(w_eval, dtype=jnp.int32)
    if dedup:
        pos_off = (lane // half).astype(jnp.float32)
        invf_lane = inv_freq[lane % half]
    else:
        pos_off = (lane // dim).astype(jnp.float32)
        invf_lane = inv_freq[(lane % dim) % half]
    pos_off = pos_off.reshape(1, w_eval)
    invf_lane = invf_lane.reshape(1, w_eval)

    # Grid / tile sizing: no ~2x ballooning, >= 2 (even) grid steps when there is
    # enough work so v7x's two TensorCores both get a share.
    sublane = 8 * max(1, 4 // itemsize)                           # f32: 8, bf16: 16
    rows_needed = _cdiv(seq_len, fold)
    max_rows = max(sublane, (max_block_bytes // (w_out * itemsize)) // sublane * sublane)
    grid_n = max(1, _cdiv(rows_needed, max_rows))
    if rows_needed > sublane and grid_n % 2 == 1:
        grid_n += 1
    tile_rows = _round_up(_cdiv(rows_needed, grid_n), sublane)
    rows_total = grid_n * tile_rows
    seq_pad = rows_total * fold

    kernel = functools.partial(_rope_cache_kernel, fold=fold, half=half, dedup=dedup)

    n_eval = rows_total * w_eval
    cost = pl.CostEstimate(
        flops=int(6 * n_eval),
        transcendentals=int(2 * n_eval),
        bytes_accessed=int(2 * rows_total * w_out * itemsize + 2 * w_eval * 4),
    )

    # TODO(synk): the angle-addition recurrence (anchor cos/sin per row sub-block) could cut
    # the transcendental count another ~4-6x for very long rebuilds; not applied here.
    cos, sin = pl.pallas_call(
        kernel,
        out_shape=(
            jax.ShapeDtypeStruct((rows_total, w_out), out_dtype),
            jax.ShapeDtypeStruct((rows_total, w_out), out_dtype),
        ),
        grid=(grid_n,),
        in_specs=[
            pl.BlockSpec((1, w_eval), lambda i: (0, 0)),
            pl.BlockSpec((1, w_eval), lambda i: (0, 0)),
        ],
        out_specs=(
            pl.BlockSpec((tile_rows, w_out), lambda i: (i, 0)),
            pl.BlockSpec((tile_rows, w_out), lambda i: (i, 0)),
        ),
        compiler_params=pltpu.CompilerParams(
            dimension_semantics=("parallel",),
            vmem_limit_bytes=32 * 1024 * 1024,
        ),
        cost_estimate=cost,
    )(pos_off, invf_lane)

    # (rows_total, fold*dim) row-major == (seq_pad, dim): layout-free reshape.
    return cos.reshape(seq_pad, dim), sin.reshape(seq_pad, dim)


class InternLMRotaryEmbedding:
    """JAX/Pallas port of xtuner InternLMRotaryEmbedding."""

    def __init__(self, dim, max_position_embeddings=2048, base=10000):
        self.dim = dim
        self.base = float(base)
        # Exact torch parity: inv_freq = 1 / base**(2k/dim); the same array is fed to the kernel.
        self.inv_freq = 1.0 / (self.base ** (jnp.arange(0, dim, 2, dtype=jnp.float32) / dim))
        self.max_seq_len_cached = max_position_embeddings
        # Caches may be padded beyond max_seq_len_cached; __call__ slices [:seq_len].
        self.cos_cached, self.sin_cached = _build_rope_cache(
            self.max_seq_len_cached, dim, self.inv_freq, jnp.float32)

    def __call__(self, x, seq_len):
        # TODO(synk): torch's `.device` mismatch check has no JAX equivalent (moot here).
        if seq_len > self.max_seq_len_cached:
            # Round growth to coarse chunks: one compile per chunk, not per distinct seq_len.
            new_len = _growth_len(seq_len)
            self.max_seq_len_cached = new_len
            self.cos_cached, self.sin_cached = _build_rope_cache(
                new_len, self.dim, self.inv_freq, x.dtype)
        elif self.cos_cached.dtype != x.dtype:
            if self.cos_cached.dtype == jnp.float32:
                # exact: torch also computes in f32 then casts — no kernel relaunch
                self.cos_cached = self.cos_cached.astype(x.dtype)
                self.sin_cached = self.sin_cached.astype(x.dtype)
            else:
                self.cos_cached, self.sin_cached = _build_rope_cache(
                    self.max_seq_len_cached, self.dim, self.inv_freq, x.dtype)
        return (self.cos_cached[:seq_len, ...], self.sin_cached[:seq_len, ...])


if __name__ == "__main__":
    key = jax.random.PRNGKey(0)

    def ref_cache(n, d, base=10000.0):
        inv_freq = 1.0 / (base ** (jnp.arange(0, d, 2, dtype=jnp.float32) / d))
        t = jnp.arange(n, dtype=jnp.float32)
        freqs = jnp.einsum("i,j->ij", t, inv_freq)
        emb = jnp.concatenate([freqs, freqs], axis=-1)
        return jnp.cos(emb), jnp.sin(emb)

    # --- small shapes: batch=2, seq=8, dim=32 (non-128-multiple -> lane-folded plain path)
    batch, seq_len, dim = 2, 8, 32
    max_pos = 16
    x = jax.random.normal(key, (batch, seq_len, dim), dtype=jnp.float32)
    rope = InternLMRotaryEmbedding(dim, max_position_embeddings=max_pos, base=10000)
    cos, sin = rope(x, seq_len)
    cos, sin = jax.block_until_ready(cos), jax.block_until_ready(sin)
    rc, rs = ref_cache(seq_len, dim)
    assert cos.shape == (seq_len, dim) and sin.shape == (seq_len, dim)
    assert cos.dtype == x.dtype and sin.dtype == x.dtype
    assert jnp.allclose(cos, rc, atol=1e-5)
    assert jnp.allclose(sin, rs, atol=1e-5)

    # dtype-only mismatch (cache long enough): cast path, no kernel relaunch
    xb = x.astype(jnp.bfloat16)
    cos_b, sin_b = rope(xb, 12)
    cos_b, sin_b = jax.block_until_ready(cos_b), jax.block_until_ready(sin_b)
    rc12, rs12 = ref_cache(12, dim)
    assert cos_b.shape == (12, dim) and cos_b.dtype == jnp.bfloat16
    assert jnp.allclose(cos_b.astype(jnp.float32), rc12, atol=2e-2)
    assert jnp.allclose(sin_b.astype(jnp.float32), rs12, atol=2e-2)

    # growth past the cached length: rebuild (chunk-rounded) directly in the consumer dtype
    long_len = max_pos + 5
    x_long = jnp.zeros((batch, long_len, dim), dtype=jnp.bfloat16)
    cos_l, sin_l = rope(x_long, long_len)
    cos_l, sin_l = jax.block_until_ready(cos_l), jax.block_until_ready(sin_l)
    rcl, rsl = ref_cache(long_len, dim)
    assert cos_l.shape == (long_len, dim) and cos_l.dtype == jnp.bfloat16
    assert jnp.allclose(cos_l.astype(jnp.float32), rcl, atol=2e-2)
    assert jnp.allclose(sin_l.astype(jnp.float32), rsl, atol=2e-2)

    # --- realistic InternLM head_dim=128: deduplicated fold=2 (roll+select) path
    dim2 = 128
    rope2 = InternLMRotaryEmbedding(dim2, max_position_embeddings=64)
    x2 = jax.random.normal(key, (batch, 40, dim2), dtype=jnp.float32)
    cos2, sin2 = rope2(x2, 40)
    cos2, sin2 = jax.block_until_ready(cos2), jax.block_until_ready(sin2)
    rc2, rs2 = ref_cache(40, dim2)
    assert cos2.shape == (40, dim2) and cos2.dtype == jnp.float32
    assert jnp.allclose(cos2, rc2, atol=3e-5)
    assert jnp.allclose(sin2, rs2, atol=3e-5)

    # --- dim=256: deduplicated fold=1 (aligned slice-store) path
    dim3 = 256
    rope3 = InternLMRotaryEmbedding(dim3, max_position_embeddings=32)
    x3 = jax.random.normal(key, (batch, 16, dim3), dtype=jnp.float32)
    cos3, sin3 = rope3(x3, 16)
    cos3, sin3 = jax.block_until_ready(cos3), jax.block_until_ready(sin3)
    rc3, rs3 = ref_cache(16, dim3)
    assert cos3.shape == (16, dim3)
    assert jnp.allclose(cos3, rc3, atol=3e-5)
    assert jnp.allclose(sin3, rs3, atol=3e-5)

    print("KERNEL_OK")
</pallas_src>

<mosaic_0001>
module attributes {stable_mosaic.version = 11 : i64} {
  func.func @_rope_cache_kernel(%arg0: i32, %arg1: memref<1x128xf32, #tpu.memory_space<vmem>>, %arg2: memref<1x128xf32, #tpu.memory_space<vmem>>, %arg3: memref<8x128xf32, #tpu.memory_space<vmem>>, %arg4: memref<8x128xf32, #tpu.memory_space<vmem>>) attributes {dimension_semantics = [#tpu.dimension_semantics<parallel>], iteration_bounds = array<i64: 1>, scalar_prefetch = 0 : i64, scratch_operands = 0 : i64, tpu.core_type = #tpu.core_type<tc>, window_params = [{pipeline_mode = #tpu.pipeline_mode<synchronous>, transform_indices = @transform_0, window_bounds = array<i64: 1, 128>}, {pipeline_mode = #tpu.pipeline_mode<synchronous>, transform_indices = @transform_1, window_bounds = array<i64: 1, 128>}, {transform_indices = @transform_2, window_bounds = array<i64: 8, 128>}, {transform_indices = @transform_3, window_bounds = array<i64: 8, 128>}]} {
    %c32_i32 = arith.constant 32 : i32
    %0 = arith.muli %arg0, %c32_i32 : i32
    %1 = tpu.iota {dimensions = array<i32: 0>} : vector<8x128xi32>
    %c4_i32 = arith.constant 4 : i32
    %2 = vector.broadcast %c4_i32 : i32 to vector<8x128xi32>
    %3 = arith.muli %1, %2 : vector<8x128xi32>
    %4 = vector.broadcast %0 : i32 to vector<8x128xi32>
    %5 = arith.addi %4, %3 : vector<8x128xi32>
    %6 = arith.sitofp %5 : vector<8x128xi32> to vector<8x128xf32>
    %c0 = arith.constant 0 : index
    %c0_0 = arith.constant 0 : index
    %7 = vector.load %arg1[%c0, %c0_0] : memref<1x128xf32, #tpu.memory_space<vmem>>, vector<1x128xf32>
    %8 = vector.broadcast %7 : vector<1x128xf32> to vector<8x128xf32>
    %9 = arith.addf %6, %8 : vector<8x128xf32>
    %c0_1 = arith.constant 0 : index
    %c0_2 = arith.constant 0 : index
    %10 = vector.load %arg2[%c0_1, %c0_2] : memref<1x128xf32, #tpu.memory_space<vmem>>, vector<1x128xf32>
    %11 = vector.broadcast %10 : vector<1x128xf32> to vector<8x128xf32>
    %12 = arith.mulf %9, %11 : vector<8x128xf32>
    %13 = math.cos %12 : vector<8x128xf32>
    %14 = math.sin %12 : vector<8x128xf32>
    %c0_3 = arith.constant 0 : index
    %c0_4 = arith.constant 0 : index
    %15 = vector.load %arg3[%c0_3, %c0_4] : memref<8x128xf32, #tpu.memory_space<vmem>>, vector<8x128xf32>
    tpu.vector_store %arg3[%c0_3, %c0_4], %13 {strides = array<i32>} : memref<8x128xf32, #tpu.memory_space<vmem>>, vector<8x128xf32>,
    %c0_5 = arith.constant 0 : index
    %c0_6 = arith.constant 0 : index
    %16 = vector.load %arg4[%c0_5, %c0_6] : memref<8x128xf32, #tpu.memory_space<vmem>>, vector<8x128xf32>
    tpu.vector_store %arg4[%c0_5, %c0_6], %14 {strides = array<i32>} : memref<8x128xf32, #tpu.memory_space<vmem>>, vector<8x128xf32>,
    return
  }
  func.func @transform_0(%arg0: i32) -> (i32, i32) {
    %c0_i32 = arith.constant 0 : i32
    %c0_i32_0 = arith.constant 0 : i32
    %c0_i32_1 = arith.constant 0 : i32
    return %c0_i32, %c0_i32_0 : i32, i32
  }
  func.func @transform_1(%arg0: i32) -> (i32, i32) {
    %c0_i32 = arith.constant 0 : i32
    %c0_i32_0 = arith.constant 0 : i32
    %c0_i32_1 = arith.constant 0 : i32
    return %c0_i32, %c0_i32_0 : i32, i32
  }
  func.func @transform_2(%arg0: i32) -> (i32, i32) {
    %c0_i32 = arith.constant 0 : i32
    %c0_i32_0 = arith.constant 0 : i32
    return %arg0, %c0_i32 : i32, i32
  }
  func.func @transform_3(%arg0: i32) -> (i32, i32) {
    %c0_i32 = arith.constant 0 : i32
    %c0_i32_0 = arith.constant 0 : i32
    return %arg0, %c0_i32 : i32, i32
  }
}

</mosaic_0001>

<bundles_post_ra>
// kernel: tpu_custom_call.1
= control target key start
LH: loop header
LB: loop body
LE: loop exit
PB: predicated region body
PF: predicated region fallthrough
CT: control target
= control target key end

     0   :  { %9 = vsyncpa [#allocation3], 0  ;;  %s476_s0 = inlined_call_operand.hbm [shape: f32[1,128], index: 0, kind: input, shape index: {}]   ;;  %s477_s1 = inlined_call_operand.vmem [shape: f32[1,128], index: 1, kind: input, shape index: {}]   ;;  %s478_s2 = inlined_call_operand.hbm [shape: f32[8,128], index: 2, kind: output, shape index: {0}]   ;;  %s479_s3 = inlined_call_operand.hbm [shape: f32[8,128], index: 3, kind: output, shape index: {1}]  }
   0x1   :  { %10 = vsyncpa [#allocation4], 0 }
   0x2   :  { %11 = vsyncpa [#allocation7], 0  ;;  %s387_s12 = smov [#allocation2]   ;;  %s315_s16 = scalar_lea.hbm %s476_s0, 16 }
   0x3   :  { %s18_s13 = sshll.u32 %s387_s12, 4  ;;  %p316_p0 = scmp.ne.s32.totalorder %s476_s0, %s315_s16  ;;  %s19_s13 = int_to_ptr.vmem [resolvable:$true] %s18_s13 }
   0x4   :  { %p319_p1 = scmp.lt.u32.totalorder %s315_s16, %s476_s0 }
   0x6   :  { %p321_p2 = pnand %p319_p1, %p316_p0 }
   0x8   :  { %324 = shalt.err (!%p321_p2)
}
   0x9   :  { %s325_s21 = scalar_lea.vmem %s19_s13, 16  ;;  %s329_s22 = scalar_lea.vmem %s19_s13, 32 }
   0xa   :  { %p326_p3 = scmp.ne.s32.totalorder %s19_s13, %s325_s21  ;;  %p330_p4 = scmp.lt.s32.totalorder %s19_s13, %s19_s13 }
   0xb   :  { %p331_p5 = scmp.lt.s32.totalorder %s329_s22, %s325_s21 }
   0xd   :  { %p332_p6 = por %p331_p5, %p330_p4 }
   0xf   :  { %p333_p7 = pnand %p332_p6, %p326_p3 }
  0x11   :  { %336 = shalt.err (!%p333_p7)
}
  0x12   :  { %21 = dma.hbm_to_vmem [thread:$0]  %s476_s0, 16, %s19_s13, [#allocation3]  }
  0x13   :  { %381 = dma.done.wait [#allocation3], 16  }
  0x14   :  { %382 = vsyncadd [#allocation3], 4294967280  ;;  %v28_v0 = vlaneseq  ;;  %v288_v4 = vld [vmem:[#allocation2] ss:$0 sm:$0xff]  ;;  %v388_v19 = vmov 683565275  }
  0x15   :  { %v289_v5 = vld [vmem:[%s477_s1] ss:$0 sm:$0xff]  ;;  %v389_v21 = vmov 2475754826   ;;  %v390_v23 = vmov 2131351028  }
  0x16   :  { %v29_v1 = vshrl.u32 %v28_v0, 7  ;;  %v391_v25 = vmov 2102212464   ;;  %v392_v27 = vmov 920167782   ;;  %s394_s0 = smov [#allocation5]  }
  0x17   :  { %v393_v34 = vmov 1326507024   ;;  %s265_s1 = sshll.u32 %s394_s0, 4  ;;  %s395_s27 = smov [#allocation6]   ;;  %s266_s1 = int_to_ptr.vmem [resolvable:$true] %s265_s1 }
  0x18   :  { %v30_v2 = vmul.u32 4, %v29_v1  ;;  %s275_s28 = sshll.u32 %s395_s27, 4  ;;  %s337_s29 = scalar_lea.vmem %s266_s1, 128  ;;  %s276_s28 = int_to_ptr.vmem [resolvable:$true] %s275_s28 }
  0x19   :  { %p338_p8 = scmp.ne.s32.totalorder %s266_s1, %s337_s29  ;;  %p342_p9 = scmp.lt.s32.totalorder %s266_s1, %s266_s1 }
  0x1a   :  { %v33_v3 = vcvt.s32.f32 %v30_v2  ;;  %p343_p10 = scmp.lt.s32.totalorder %s337_s29, %s337_s29 }
  0x1c   :  { %v41_v6 = vadd.f32 %v288_v4, %v33_v3  ;;  %p344_p11 = por %p343_p10, %p342_p9 }
  0x1e   :  { %v431_v7 = vmul.f32 %v289_v5, %v41_v6  ;;  %p345_p12 = pnand %p344_p11, %p338_p8 }
  0x20   :  { %v53_v8 = vand.u32 2139095040, %v431_v7  ;;  %v50_v10 = vand.u32 2147483647, %v431_v7  ;;  %vm52_vm7 = vcmp.lt.s32.totalorder %v431_v7, 0  ;;  %vm142_vm15 = vweird.f32 %v431_v7 }
  0x22   :  { %v54_v9 = vshrl.u32 %v53_v8, 23  ;;  %v57_v13 = vand.u32 8388607, %v50_v10  ;;  %vm51_vm8 = vcmp.le.f32.partialorder %v50_v10, 0.7853982 }
  0x24   :  { %v290_v11 = vadd.s32 4294967169, %v54_v9  ;;  %v58_v16 = vor.u32 8388608, %v57_v13 }
  0x26   :  { %v60_v12 = vadd.s32 1, %v290_v11  ;;  %v98_v36 = vshll.u32 %v58_v16, 8 }
  0x28   :  { %vm61_vm0 = vcmp.gt.s32.totalorder %v60_v12, 0 }
  0x29   :  { %v62_v14 = vsel %vm61_vm0, %v60_v12, 0 }
  0x2a   :  { %v64_v15 = vand.u32 31, %v62_v14  ;;  %v63_v17 = vshrl.u32 %v62_v14, 5 }
  0x2c   :  { %v65_v18 = vsub.s32 32, %v64_v15  ;;  %v67_v20 = vshll.u32 %v388_v19, %v64_v15  ;;  %v70_v22 = vshll.u32 %v389_v21, %v64_v15  ;;  %v73_v24 = vshll.u32 %v390_v23, %v64_v15 }
  0x2d   :  { %v76_v26 = vshll.u32 %v391_v25, %v64_v15  ;;  %v79_v28 = vshll.u32 %v392_v27, %v64_v15  ;;  %vm82_vm1 = vcmp.lt.s32.totalorder %v63_v17, 1  ;;  %vm85_vm2 = vcmp.lt.s32.totalorder %v63_v17, 4 }
  0x2e   :  { %v66_v29 = vshrl.u32 %v388_v19, %v65_v18  ;;  %v68_v30 = vshrl.u32 %v389_v21, %v65_v18  ;;  %v71_v31 = vshrl.u32 %v390_v23, %v65_v18  ;;  %v74_v32 = vshrl.u32 %v391_v25, %v65_v18 }
  0x2f   :  { %v77_v33 = vshrl.u32 %v392_v27, %v65_v18  ;;  %v80_v35 = vshrl.u32 %v393_v34, %v65_v18  ;;  %vm83_vm3 = vcmp.lt.s32.totalorder %v63_v17, 2  ;;  %vm84_vm4 = vcmp.lt.s32.totalorder %v63_v17, 3 }
  0x30   :  { %v69_v37 = vor.u32 %v68_v30, %v67_v20  ;;  %v72_v38 = vor.u32 %v71_v31, %v70_v22  ;;  %v75_v39 = vor.u32 %v74_v32, %v73_v24 }
  0x31   :  { %v78_v40 = vor.u32 %v77_v33, %v76_v26  ;;  %v81_v41 = vor.u32 %v80_v35, %v79_v28 }
  0x32   :  { %v86_v42 = vsel %vm82_vm1, %v66_v29, %v69_v37  ;;  %v87_v43 = vsel %vm85_vm2, %v75_v39, 2102212464  ;;  %v90_v44 = vsel %vm82_vm1, %v69_v37, %v72_v38  ;;  %v94_v45 = vsel %vm82_vm1, %v72_v38, %v75_v39 }
  0x33   :  { %v88_v46 = vsel %vm84_vm4, %v72_v38, %v87_v43  ;;  %v91_v47 = vsel %vm85_vm2, %v78_v40, 920167782  ;;  %v95_v48 = vsel %vm85_vm2, %v81_v41, 1326507024 }
  0x34   :  { %v92_v49 = vsel %vm84_vm4, %v75_v39, %v91_v47  ;;  %v96_v50 = vsel %vm84_vm4, %v78_v40, %v95_v48  ;;  %v89_v51 = vsel %vm83_vm3, %v86_v42, %v88_v46 }
  0x35   :  { %v93_v52 = vsel %vm83_vm3, %v90_v44, %v92_v49  ;;  %v97_v53 = vsel %vm83_vm3, %v94_v45, %v96_v50  ;;  %v105_v58 = vmul.u32 %v98_v36, %v89_v51 }
  0x36   :  { %v437_v54 = vmul.u32.u64.low %v98_v36, %v97_v53  ;;  %v438_v55 = vmul.u32.u64.high %v98_v36, %v97_v53, %v437_v54  ;;  %v440_v56 = vmul.u32.u64.low %v98_v36, %v93_v52  ;;  %v441_v57 = vmul.u32.u64.high %v98_v36, %v93_v52, %v440_v56 }
  0x38   :  { %vm107_vm5 = vc.u32 %v438_v55, %v440_v56  ;;  %v108_v59 = vadd.s32 1, %v441_v57  ;;  %v106_v6 = vadd.s32 %v440_v56, %v438_v55 }
  0x3a   :  { %v109_v60 = vsel %vm107_vm5, %v108_v59, %v441_v57 }
  0x3b   :  { %v110_v61 = vadd.s32 %v109_v60, %v105_v58 }
  0x3d   :  { %v111_v62 = vadd.s32 536870912, %v110_v61 }
  0x3f   :  { %v112_v63 = vshrl.u32 %v111_v62, 30 }
  0x41   :  { %v113_v0 = vshll.u32 %v112_v63, 30  ;;  %v136_v20 = vsub.s32 4, %v112_v63 }
  0x43   :  { %v114_v1 = vsub.s32 %v110_v61, %v113_v0  ;;  %v137_v23 = vsel %vm52_vm7, %v136_v20, %v112_v63 }
  0x44   :  { %v139_v26 = vsel %vm51_vm8, 0, %v137_v23 }
  0x45   :  { %v116_v2 = vsub.s32 0, %v114_v1  ;;  %v246_v27 = vadd.s32 3, %v139_v26  ;;  %v143_v28 = vand.u32 3, %v139_v26 }
  0x47   :  { %v291_v3 = vmin.u32 %v116_v2, %v114_v1  ;;  %v247_v29 = vand.u32 3, %v246_v27  ;;  %vm148_vm9 = vcmp.eq.s32.totalorder %v143_v28, 2  ;;  %vm145_vm11 = vcmp.eq.s32.totalorder %v143_v28, 0 }
  0x48   :  { %vm144_vm13 = vcmp.lt.s32.totalorder %v143_v28, 2 }
  0x49   :  { %v118_v4 = vclz %v291_v3  ;;  %vm252_vm10 = vcmp.eq.s32.totalorder %v247_v29, 2  ;;  %vm249_vm12 = vcmp.eq.s32.totalorder %v247_v29, 0  ;;  %vm248_vm14 = vcmp.lt.s32.totalorder %v247_v29, 2 }
  0x4b   :  { %v292_v5 = vadd.s32 4294967294, %v118_v4 }
  0x4d   :  { %vm293_vm6 = vcmp.lt.s32.totalorder %v292_v5, 0 }
  0x4e   :  { %v121_v8 = vsel %vm293_vm6, 0, %v292_v5 }
  0x4f   :  { %v122_v9 = vsub.s32 32, %v121_v8  ;;  %v123_v11 = vshll.u32 %v114_v1, %v121_v8  ;;  %v126_v12 = vsub.s32 4294967266, %v121_v8 }
  0x51   :  { %v124_v13 = vshrl.u32 %v106_v6, %v122_v9  ;;  %v127_v14 = vadd.s32 127, %v126_v12 }
  0x53   :  { %v125_v15 = vor.u32 %v124_v13, %v123_v11  ;;  %v128_v16 = vshll.u32 %v127_v14, 23 }
  0x55   :  { %v129_v17 = vor.u32 4788187, %v128_v16  ;;  %v132_v18 = vcvt.s32.f32 %v125_v15 }
  0x57   :  { %v130_v19 = vand.u32 2147483647, %v129_v17 }
  0x59   :  { %v133_v21 = vmul.f32 %v132_v18, %v130_v19 }
  0x5b   :  { %v134_v22 = vxor.u32 2147483648, %v133_v21 }
  0x5d   :  { %v135_v24 = vsel %vm52_vm7, %v134_v22, %v133_v21 }
  0x5e   :  { %v138_v25 = vsel %vm51_vm8, %v431_v7, %v135_v24 }
  0x5f   :  { %311 = vcosq.f32 %v138_v25 }
  0x60   :  { %313 = vsinq.f32 %v138_v25 }
  0x69   :  { %v312_v30 = vpop.eup %311 }
  0x6a   :  { %v314_v31 = vpop.eup %313  ;;  %v149_v32 = vxor.u32 2147483648, %v312_v30 }
  0x6b   :  { %v146_v10 = vxor.u32 2147483648, %v314_v31 }
  0x6c   :  { %v150_v33 = vsel %vm148_vm9, %v149_v32, %v314_v31  ;;  %v254_v34 = vsel %vm252_vm10, %v149_v32, %v314_v31 }
  0x6d   :  { %v147_v35 = vsel %vm145_vm11, %v312_v30, %v146_v10  ;;  %v251_v36 = vsel %vm249_vm12, %v312_v30, %v146_v10 }
  0x6e   :  { %v151_v37 = vsel %vm144_vm13, %v147_v35, %v150_v33  ;;  %v255_v38 = vsel %vm248_vm14, %v251_v36, %v254_v34 }
  0x6f   :  { %v152_v39 = vsel %vm142_vm15, nan, %v151_v37  ;;  %v256_v40 = vsel %vm142_vm15, nan, %v255_v38 }
  0x70   :  { %257 = vst [vmem:[#allocation5] sm:$0xff] %v152_v39  ;;  %258 = vst [vmem:[#allocation6] sm:$0xff] %v256_v40 }
  0x71   :  { %348 = shalt.err (!%p345_p12)
}
  0x72   :  { %s349_s5 = scalar_lea.hbm %s478_s2, 128 }
  0x73   :  { %p350_p13 = scmp.ne.s32.totalorder %s478_s2, %s349_s5  ;;  %p353_p0 = scmp.lt.u32.totalorder %s349_s5, %s478_s2 }
  0x75   :  { %p355_p1 = pnand %p353_p0, %p350_p13 }
  0x77   :  { %358 = shalt.err (!%p355_p1)
}
  0x78   :  { %268 = dma.vmem_to_hbm [thread:$0]  %s266_s1, 128, %s478_s2, [#allocation4]  }
  0x79   :  { %s359_s12 = scalar_lea.vmem %s276_s28, 128  ;;  %p364_p3 = scmp.lt.s32.totalorder %s276_s28, %s276_s28 }
  0x7a   :  { %p360_p2 = scmp.ne.s32.totalorder %s276_s28, %s359_s12  ;;  %p365_p4 = scmp.lt.s32.totalorder %s359_s12, %s359_s12 }
  0x7c   :  { %p366_p5 = por %p365_p4, %p364_p3 }
  0x7e   :  { %p367_p6 = pnand %p366_p5, %p360_p2 }
  0x80   :  { %370 = shalt.err (!%p367_p6)
}
  0x81   :  { %s371_s15 = scalar_lea.hbm %s479_s3, 128 }
  0x82   :  { %p372_p7 = scmp.ne.s32.totalorder %s479_s3, %s371_s15  ;;  %p375_p8 = scmp.lt.u32.totalorder %s371_s15, %s479_s3 }
  0x84   :  { %p377_p9 = pnand %p375_p8, %p372_p7 }
  0x86   :  { %380 = shalt.err (!%p377_p9)
}
  0x87   :  { %278 = dma.vmem_to_hbm [thread:$0]  %s276_s28, 128, %s479_s3, [#allocation7]  }
  0x88   :  { %383 = dma.done.wait [#allocation4], 128  }
  0x89   :  { %384 = vsyncadd [#allocation4], 4294967168 }
  0x8a   :  { %385 = dma.done.wait [#allocation7], 128  }
  0x8b   :  { %386 = vsyncadd [#allocation7], 4294967168 }
  0x8c   :  { %285 = vsyncpa [#allocation3], 1 }
  0x8d   :  { %286 = vsyncpa [#allocation4], 1 }
  0x8e   :  { %287 = vsyncpa [#allocation7], 1 }

</bundles_post_ra>
